<compile_context>
chip_gen: v5e
topology: v5e:2x2
jax: 0.10.0
libtpu: 0.0.40
codegen_flags: <defaults>
</compile_context>

<pallas_src>
import functools

import jax
import jax.numpy as jnp
from jax import lax
from jax.experimental import pallas as pl
from jax.experimental.pallas import tpu as pltpu

EPS = 1e-5


# ----------------------------------------------------------------------------
# tiling helpers
# ----------------------------------------------------------------------------
def _largest_divisor(n, cap, multiple_of=1):
    best = None
    i = 1
    while i * i <= n:
        if n % i == 0:
            for c in (i, n // i):
                if c <= cap and c % multiple_of == 0 and (best is None or c > best):
                    best = c
        i += 1
    return best


def _row_tile(n_rows, row_bytes, budget=4 << 20, sublane_align=False):
    # biggest row tile that divides n_rows and fits the VMEM budget — amortizes
    # the ~0.35us/grid-step overhead (whole array in one tile at toy sizes).
    if n_rows * row_bytes <= budget:
        return n_rows
    cap = max(1, budget // row_bytes)
    if sublane_align:
        d = _largest_divisor(n_rows, cap, multiple_of=8)
        if d:
            return d
    return _largest_divisor(n_rows, cap, multiple_of=1) or n_rows


# ----------------------------------------------------------------------------
# MaxPool2d(2): x is read once; the 2x2 window selection happens in-kernel.
# ----------------------------------------------------------------------------
def _pool_kernel(c_in, x_ref, o_ref):
    v = x_ref[...]                                  # (pt, 2, Wh, 2*C)
    m = jnp.maximum(v[:, 0], v[:, 1])               # max over the 2 pooled rows
    o_ref[...] = jnp.maximum(m[:, :, :c_in], m[:, :, c_in:])   # max over cols


def maxpool2x2(x_nhwc):
    N, H, W, C = x_nhwc.shape
    assert H % 2 == 0 and W % 2 == 0, "MaxPool2d(2) expects even spatial dims"
    Hh, Wh = H // 2, W // 2
    rows = N * Hh
    # free row-major view pairing the two pooled rows / the two pooled columns
    xr = x_nhwc.reshape(rows, 2, Wh, 2 * C)
    pt = _row_tile(rows, 2 * Wh * 2 * C * 4)
    out = pl.pallas_call(
        functools.partial(_pool_kernel, C),
        out_shape=jax.ShapeDtypeStruct((rows, Wh, C), x_nhwc.dtype),
        grid=(rows // pt,),
        in_specs=[pl.BlockSpec((pt, 2, Wh, 2 * C), lambda i: (i, 0, 0, 0))],
        out_specs=pl.BlockSpec((pt, Wh, C), lambda i: (i, 0, 0)),
        compiler_params=pltpu.CompilerParams(dimension_semantics=("parallel",)),
    )(xr)
    return out.reshape(N, Hh, Wh, C)


# ----------------------------------------------------------------------------
# 3x3 conv on a flattened padded-spatial layout, with
#   * optional fused BN+ReLU prologue (previous layer's batch-norm),
#   * interior mask implementing the zero padding,
#   * fused BN partial statistics (per-image sum / sum-of-squares) epilogue.
# Conv bias is intentionally dropped: it is cancelled by the BN mean subtraction.
# ----------------------------------------------------------------------------
def _conv_kernel(Hh, Wh, Cin, Cout, bn_prologue,
                 x_ref, w_ref, sc_ref, sh_ref, y_ref, sum_ref, sq_ref):
    Wp = Wh + 2                      # padded row width (output is on this grid)
    S_in = (Hh + 3) * Wp             # 1 top pad + Hh rows + 2 bottom pad rows
    S_out = Hh * Wp

    x = x_ref[0].astype(jnp.float32)                       # (S_in, Cin)
    if bn_prologue:
        # fused BatchNorm + ReLU of the previous layer (prologue)
        x = jnp.maximum(x * sc_ref[...] + sh_ref[...], 0.0)

    # interior mask == zero padding (pad-region values need not be zero)
    r_in = lax.broadcasted_iota(jnp.int32, (S_in, 1), 0)
    h_p, w_p = r_in // Wp, r_in % Wp
    interior = (h_p >= 1) & (h_p <= Hh) & (w_p >= 1) & (w_p <= Wh)
    x = jnp.where(interior, x, 0.0)

    # 9 shifted taps, each a contiguous row slice -> MXU dot with one weight slab
    taps = [(dy, dx) for dy in range(3) for dx in range(3)]
    acc = jnp.zeros((S_out, Cout), jnp.float32)
    for t, (dy, dx) in enumerate(taps):
        off = dy * Wp + dx
        acc = acc + jnp.dot(x[off:off + S_out, :],
                            w_ref[t * Cin:(t + 1) * Cin, :],
                            preferred_element_type=jnp.float32)

    # epilogue: per-image BN partial stats over the valid output columns only
    r_out = lax.broadcasted_iota(jnp.int32, (S_out, 1), 0)
    valid = (r_out % Wp) < Wh
    acc_v = jnp.where(valid, acc, 0.0)
    sum_ref[0] = jnp.sum(acc_v, axis=0, keepdims=True)
    sq_ref[0] = jnp.sum(acc_v * acc_v, axis=0, keepdims=True)
    y_ref[0] = acc                   # includes 2 throw-away columns per row


def conv3x3_bn_stats(x_flat, wmat, scale_prev, shift_prev, bn_prologue,
                     N, Hh, Wh, Cin, Cout):
    """x_flat: (N, (Hh+3)*(Wh+2), Cin) activation on the padded flat grid.
    Returns y (N, Hh*(Wh+2), Cout) plus per-image channel sums / sum-of-squares
    (over valid columns) for the batch-norm of this layer."""
    Wp = Wh + 2
    S_in = (Hh + 3) * Wp
    S_out = Hh * Wp

    kern = functools.partial(_conv_kernel, Hh, Wh, Cin, Cout, bn_prologue)
    flops = 2 * N * S_out * 9 * Cin * Cout
    bytes_acc = 4 * (N * S_in * Cin + 9 * Cin * Cout
                     + N * S_out * Cout + 2 * N * Cout)
    y, s, sq = pl.pallas_call(
        kern,
        out_shape=(jax.ShapeDtypeStruct((N, S_out, Cout), jnp.float32),
                   jax.ShapeDtypeStruct((N, 1, Cout), jnp.float32),
                   jax.ShapeDtypeStruct((N, 1, Cout), jnp.float32)),
        grid=(N,),
        in_specs=[pl.BlockSpec((1, S_in, Cin), lambda n: (n, 0, 0)),
                  pl.BlockSpec((9 * Cin, Cout), lambda n: (0, 0)),
                  pl.BlockSpec((1, Cin), lambda n: (0, 0)),
                  pl.BlockSpec((1, Cin), lambda n: (0, 0))],
        out_specs=(pl.BlockSpec((1, S_out, Cout), lambda n: (n, 0, 0)),
                   pl.BlockSpec((1, 1, Cout), lambda n: (n, 0, 0)),
                   pl.BlockSpec((1, 1, Cout), lambda n: (n, 0, 0))),
        compiler_params=pltpu.CompilerParams(dimension_semantics=("parallel",)),
        cost_estimate=pl.CostEstimate(flops=flops, transcendentals=0,
                                      bytes_accessed=bytes_acc),
    )(x_flat, wmat, scale_prev, shift_prev)
    return y, s, sq


def _bn_scale_shift(sum_p, sq_p, count, gamma, beta):
    mean = jnp.sum(sum_p, axis=(0, 1)) / count
    var = jnp.sum(sq_p, axis=(0, 1)) / count - mean * mean   # biased (training)
    scale = gamma * lax.rsqrt(var + EPS)
    shift = beta - mean * scale
    return (scale.reshape(1, -1).astype(jnp.float32),
            shift.reshape(1, -1).astype(jnp.float32))


# ----------------------------------------------------------------------------
# Final BN + ReLU: lane-dense elementwise pass on a free (rows, 128) view.
# ----------------------------------------------------------------------------
def _bn_relu_kernel(y_ref, sc_ref, sh_ref, o_ref):
    o_ref[...] = jnp.maximum(y_ref[...] * sc_ref[...] + sh_ref[...], 0.0)


def batchnorm_relu(y, scale, shift):
    C = y.shape[-1]
    total = y.size
    if C % 128 == 0:                       # already lane-dense
        L, rep = C, 1
    elif 128 % C == 0 and total % 128 == 0:  # pack 128//C positions per vreg row
        L, rep = 128, 128 // C
    else:                                  # fallback: lane-sparse stores
        L, rep = C, 1
    yf = y.reshape(-1, L)
    rows = yf.shape[0]
    sc = jnp.tile(scale.reshape(1, C), (1, rep))
    sh = jnp.tile(shift.reshape(1, C), (1, rep))
    rt = _row_tile(rows, L * 4, sublane_align=True)
    out = pl.pallas_call(
        _bn_relu_kernel,
        out_shape=jax.ShapeDtypeStruct((rows, L), jnp.float32),
        grid=(rows // rt,),
        in_specs=[pl.BlockSpec((rt, L), lambda i: (i, 0)),
                  pl.BlockSpec((1, L), lambda i: (0, 0)),
                  pl.BlockSpec((1, L), lambda i: (0, 0))],
        out_specs=pl.BlockSpec((rt, L), lambda i: (i, 0)),
        compiler_params=pltpu.CompilerParams(dimension_semantics=("parallel",)),
    )(yf, sc, sh)
    return out.reshape(y.shape)


# ----------------------------------------------------------------------------
# Down(in_channel, out_channel) forward
# ----------------------------------------------------------------------------
def down_forward(x_nchw, params):
    x = jnp.transpose(x_nchw, (0, 2, 3, 1))            # NCHW -> NHWC
    N, H, W, C1 = x.shape
    Hh, Wh = H // 2, W // 2
    Wp = Wh + 2
    C2 = params["w1"].shape[-1]
    count = N * Hh * Wh

    # --- MaxPool2d(2) --------------------------------------------------------
    p = maxpool2x2(x)                                   # (N, Hh, Wh, C1)

    # --- Conv1 (+ fused BN1 partial stats; bias dropped — cancelled by BN) ---
    xp1 = jnp.pad(p, ((0, 0), (1, 2), (1, 1), (0, 0))).reshape(
        N, (Hh + 3) * Wp, C1)
    w1 = params["w1"].reshape(9 * C1, C2).astype(jnp.float32)
    one1 = jnp.ones((1, C1), jnp.float32)
    zero1 = jnp.zeros((1, C1), jnp.float32)
    y1, s1, q1 = conv3x3_bn_stats(xp1, w1, one1, zero1, False,
                                  N, Hh, Wh, C1, C2)
    scale1, shift1 = _bn_scale_shift(s1, q1, count, params["g1"], params["beta1"])

    # --- Conv2 with fused BN1+ReLU prologue (+ fused BN2 partial stats) ------
    # y1 already lives on a (Hh, Wh+2) row grid; a flat front/back zero pad
    # re-aligns it onto the conv input grid (pad rows & throw-away columns are
    # neutralised by the in-kernel interior mask).
    x2 = jnp.pad(y1, ((0, 0), (Wp + 1, 2 * Wp - 1), (0, 0)))
    w2 = params["w2"].reshape(9 * C2, C2).astype(jnp.float32)
    y2, s2, q2 = conv3x3_bn_stats(x2, w2, scale1, shift1, True,
                                  N, Hh, Wh, C2, C2)
    scale2, shift2 = _bn_scale_shift(s2, q2, count, params["g2"], params["beta2"])

    # --- Final BN2 + ReLU (lane-dense) ---------------------------------------
    z2 = batchnorm_relu(y2, scale2, shift2)             # (N, Hh*Wp, C2)

    # strip the 2 throw-away columns, back to NCHW
    z2 = z2.reshape(N, Hh, Wp, C2)[:, :, :Wh, :]
    return jnp.transpose(z2, (0, 3, 1, 2))


# ----------------------------------------------------------------------------
# Pure-JAX reference (correctness check only)
# ----------------------------------------------------------------------------
def down_reference(x_nchw, params):
    x = jnp.transpose(x_nchw, (0, 2, 3, 1))
    N, H, W, C = x.shape
    x = x.reshape(N, H // 2, 2, W // 2, 2, C).max(axis=(2, 4))

    def conv(z, w, b):
        return lax.conv_general_dilated(
            z, w, (1, 1), "SAME",
            dimension_numbers=("NHWC", "HWIO", "NHWC"),
            precision=lax.Precision.HIGHEST) + b

    def bn_relu(z, g, bt):
        m = z.mean(axis=(0, 1, 2))
        v = z.var(axis=(0, 1, 2))
        return jnp.maximum((z - m) / jnp.sqrt(v + EPS) * g + bt, 0.0)

    x = bn_relu(conv(x, params["w1"], params["b1"]), params["g1"], params["beta1"])
    x = bn_relu(conv(x, params["w2"], params["b2"]), params["g2"], params["beta2"])
    return jnp.transpose(x, (0, 3, 1, 2))


# ----------------------------------------------------------------------------
if __name__ == "__main__":
    in_channel, out_channel = 4, 8
    N, H, W = 2, 16, 16

    key = jax.random.PRNGKey(0)
    kx, kw1, kb1, kw2, kb2 = jax.random.split(key, 5)

    x = jax.random.normal(kx, (N, in_channel, H, W), dtype=jnp.float32)

    # Parameter shapes follow nn.Conv2d / nn.BatchNorm2d.  The conv biases are
    # kept in the param dict (the reference uses them) but the Pallas forward
    # omits them: training-mode BN mean subtraction cancels them exactly.
    params = {
        "w1": 0.2 * jax.random.normal(kw1, (3, 3, in_channel, out_channel), jnp.float32),
        "b1": 0.1 * jax.random.normal(kb1, (out_channel,), jnp.float32),
        "g1": jnp.ones((out_channel,), jnp.float32),
        "beta1": jnp.zeros((out_channel,), jnp.float32),
        "w2": 0.2 * jax.random.normal(kw2, (3, 3, out_channel, out_channel), jnp.float32),
        "b2": 0.1 * jax.random.normal(kb2, (out_channel,), jnp.float32),
        "g2": jnp.ones((out_channel,), jnp.float32),
        "beta2": jnp.zeros((out_channel,), jnp.float32),
    }

    out = jax.block_until_ready(down_forward(x, params))
    ref = jax.block_until_ready(down_reference(x, params))

    assert out.shape == (N, out_channel, H // 2, W // 2), out.shape
    assert jnp.allclose(out, ref, rtol=2e-3, atol=2e-3), \
        float(jnp.max(jnp.abs(out - ref)))

    print("KERNEL_OK")
</pallas_src>

<mosaic_0001>
module attributes {stable_mosaic.version = 11 : i64} {
  func.func @_pool_kernel(%arg0: i32, %arg1: memref<16x2x8x8xf32, #tpu.memory_space<vmem>>, %arg2: memref<16x8x4xf32, #tpu.memory_space<vmem>>) attributes {dimension_semantics = [#tpu.dimension_semantics<parallel>], iteration_bounds = array<i64: 1>, scalar_prefetch = 0 : i64, scratch_operands = 0 : i64, tpu.core_type = #tpu.core_type<tc>, window_params = [{transform_indices = @transform_0, window_bounds = array<i64: 16, 2, 8, 8>}, {transform_indices = @transform_1, window_bounds = array<i64: 16, 8, 4>}]} {
    %c0 = arith.constant 0 : index
    %c0_0 = arith.constant 0 : index
    %c0_1 = arith.constant 0 : index
    %c0_2 = arith.constant 0 : index
    %0 = vector.load %arg1[%c0, %c0_0, %c0_1, %c0_2] : memref<16x2x8x8xf32, #tpu.memory_space<vmem>>, vector<16x2x8x8xf32>
    %1 = vector.extract_strided_slice %0 {offsets = [0, 0, 0, 0], sizes = [16, 1, 8, 8], strides = [1, 1, 1, 1]} : vector<16x2x8x8xf32> to vector<16x1x8x8xf32>
    %2 = vector.shape_cast %1 : vector<16x1x8x8xf32> to vector<16x8x8xf32>
    %3 = vector.extract_strided_slice %0 {offsets = [0, 1, 0, 0], sizes = [16, 1, 8, 8], strides = [1, 1, 1, 1]} : vector<16x2x8x8xf32> to vector<16x1x8x8xf32>
    %4 = vector.shape_cast %3 : vector<16x1x8x8xf32> to vector<16x8x8xf32>
    %5 = arith.maximumf %2, %4 : vector<16x8x8xf32>
    %6 = vector.extract_strided_slice %5 {offsets = [0, 0, 0], sizes = [16, 8, 4], strides = [1, 1, 1]} : vector<16x8x8xf32> to vector<16x8x4xf32>
    %7 = vector.extract_strided_slice %5 {offsets = [0, 0, 4], sizes = [16, 8, 4], strides = [1, 1, 1]} : vector<16x8x8xf32> to vector<16x8x4xf32>
    %8 = arith.maximumf %6, %7 : vector<16x8x4xf32>
    %c0_3 = arith.constant 0 : index
    %c0_4 = arith.constant 0 : index
    %c0_5 = arith.constant 0 : index
    %9 = vector.load %arg2[%c0_3, %c0_4, %c0_5] : memref<16x8x4xf32, #tpu.memory_space<vmem>>, vector<16x8x4xf32>
    tpu.vector_store %arg2[%c0_3, %c0_4, %c0_5], %8 {strides = array<i32>} : memref<16x8x4xf32, #tpu.memory_space<vmem>>, vector<16x8x4xf32>,
    return
  }
  func.func @transform_0(%arg0: i32) -> (i32, i32, i32, i32) {
    %c0_i32 = arith.constant 0 : i32
    %c0_i32_0 = arith.constant 0 : i32
    %c0_i32_1 = arith.constant 0 : i32
    %c0_i32_2 = arith.constant 0 : i32
    return %arg0, %c0_i32, %c0_i32_0, %c0_i32_1 : i32, i32, i32, i32
  }
  func.func @transform_1(%arg0: i32) -> (i32, i32, i32) {
    %c0_i32 = arith.constant 0 : i32
    %c0_i32_0 = arith.constant 0 : i32
    %c0_i32_1 = arith.constant 0 : i32
    return %arg0, %c0_i32, %c0_i32_0 : i32, i32, i32
  }
}

</mosaic_0001>

<bundles_post_ra>
// kernel: tpu_custom_call.1
= control target key start
LH: loop header
LB: loop body
LE: loop exit
PB: predicated region body
PF: predicated region fallthrough
CT: control target
= control target key end

     0   :  { %s158_s14 = smov 124   ;;  %vm136_vm0 = vcmask 31744   ;;  %s377_s0 = inlined_call_operand.vmem [shape: f32[16,2,8,8], index: 0, kind: input, shape index: {}]   ;;  %s378_s1 = inlined_call_operand.vmem [shape: f32[16,8,4], index: 1, kind: output, shape index: {}]  }
   0x1   :  { %v8_v0 = vld [vmem:[%s377_s0] sm:$0xff]  ;;  %v9_v1 = vld [vmem:[%s377_s0 + $0x8] sm:$0xff]  ;;  %v10_v6 = vld [vmem:[%s377_s0 + $0x10] sm:$0xff] }
   0x2   :  { %v12_v2 = vld [vmem:[%s377_s0 + $0x20] sm:$0xff]  ;;  %v178_v3 = vmax.f32 %v8_v0, %v9_v1  ;;  %v13_v4 = vld [vmem:[%s377_s0 + $0x28] sm:$0xff]  ;;  %v11_v7 = vld [vmem:[%s377_s0 + $0x18] sm:$0xff] }
   0x3   :  { %v183_v5 = vmax.f32 %v12_v2, %v13_v4  ;;  %v16_v8 = vld [vmem:[%s377_s0 + $0x40] sm:$0xff]  ;;  %v14_v9 = vld [vmem:[%s377_s0 + $0x30] sm:$0xff]  ;;  %v15_v10 = vld [vmem:[%s377_s0 + $0x38] sm:$0xff]  ;;  %v207_v13 = vmax.f32 %v10_v6, %v11_v7 }
   0x4   :  { %72 = vrot.lane.b32.xlu0 %v178_v3, %s158_s14  ;;  %v17_v11 = vld [vmem:[%s377_s0 + $0x48] sm:$0xff]  ;;  %v209_v14 = vmax.f32 %v14_v9, %v15_v10  ;;  %v18_v15 = vld [vmem:[%s377_s0 + $0x50] sm:$0xff]  ;;  %v19_v16 = vld [vmem:[%s377_s0 + $0x58] sm:$0xff] }
   0x5   :  { %76 = vrot.lane.b32.xlu1 %v183_v5, %s158_s14  ;;  %v44_v12 = vmax.f32 %v16_v8, %v17_v11  ;;  %v20_v17 = vld [vmem:[%s377_s0 + $0x60] sm:$0xff]  ;;  %v21_v18 = vld [vmem:[%s377_s0 + $0x68] sm:$0xff]  ;;  %v45_v19 = vmax.f32 %v18_v15, %v19_v16  ;;  %v22_v20 = vld [vmem:[%s377_s0 + $0x70] sm:$0xff] }
   0x6   :  { %v23_v21 = vld [vmem:[%s377_s0 + $0x78] sm:$0xff]  ;;  %v234_v22 = vmax.f32 %v20_v17, %v21_v18  ;;  %v24_v24 = vld [vmem:[%s377_s0 + $0x80] sm:$0xff]  ;;  %v25_v25 = vld [vmem:[%s377_s0 + $0x88] sm:$0xff] }
   0x7   :  { %80 = vrot.lane.b32.xlu2 %v44_v12, %s158_s14  ;;  %v236_v23 = vmax.f32 %v22_v20, %v23_v21  ;;  %v26_v26 = vld [vmem:[%s377_s0 + $0x90] sm:$0xff]  ;;  %v27_v27 = vld [vmem:[%s377_s0 + $0x98] sm:$0xff]  ;;  %v48_v28 = vmax.f32 %v24_v24, %v25_v25  ;;  %v28_v29 = vld [vmem:[%s377_s0 + $0xa0] sm:$0xff] }
   0x8   :  { %v29_v30 = vld [vmem:[%s377_s0 + $0xa8] sm:$0xff]  ;;  %v261_v31 = vmax.f32 %v26_v26, %v27_v27  ;;  %v30_v33 = vld [vmem:[%s377_s0 + $0xb0] sm:$0xff]  ;;  %v31_v34 = vld [vmem:[%s377_s0 + $0xb8] sm:$0xff] }
   0x9   :  { %v263_v32 = vmax.f32 %v28_v29, %v29_v30  ;;  %v32_v35 = vld [vmem:[%s377_s0 + $0xc0] sm:$0xff]  ;;  %v33_v36 = vld [vmem:[%s377_s0 + $0xc8] sm:$0xff]  ;;  %v51_v37 = vmax.f32 %v30_v33, %v31_v34  ;;  %v34_v38 = vld [vmem:[%s377_s0 + $0xd0] sm:$0xff] }
   0xa   :  { %v35_v39 = vld [vmem:[%s377_s0 + $0xd8] sm:$0xff]  ;;  %v52_v40 = vmax.f32 %v32_v35, %v33_v36  ;;  %v36_v42 = vld [vmem:[%s377_s0 + $0xe0] sm:$0xff]  ;;  %v37_v43 = vld [vmem:[%s377_s0 + $0xe8] sm:$0xff] }
   0xb   :  { %v53_v41 = vmax.f32 %v34_v38, %v35_v39  ;;  %v38_v44 = vld [vmem:[%s377_s0 + $0xf0] sm:$0xff]  ;;  %v39_v45 = vld [vmem:[%s377_s0 + $0xf8] sm:$0xff]  ;;  %v54_v46 = vmax.f32 %v36_v42, %v37_v43 }
   0xc   :  { %74 = vrot.lane.b32.xlu0 %v207_v13, %s158_s14  ;;  %v55_v47 = vmax.f32 %v38_v44, %v39_v45 }
   0xd   :  { %78 = vrot.lane.b32.xlu1 %v209_v14, %s158_s14 }
   0xf   :  { %82 = vrot.lane.b32.xlu2 %v45_v19, %s158_s14 }
  0x14   :  { %84 = vrot.lane.b32.xlu0 %v234_v22, %s158_s14 }
  0x15   :  { %86 = vrot.lane.b32.xlu1 %v236_v23, %s158_s14 }
  0x17   :  { %88 = vrot.lane.b32.xlu2 %v48_v28, %s158_s14 }
  0x1c   :  { %90 = vrot.lane.b32.xlu0 %v261_v31, %s158_s14 }
  0x1d   :  { %92 = vrot.lane.b32.xlu1 %v263_v32, %s158_s14 }
  0x1f   :  { %94 = vrot.lane.b32.xlu2 %v51_v37, %s158_s14 }
  0x24   :  { %96 = vrot.lane.b32.xlu0 %v52_v40, %s158_s14 }
  0x25   :  { %98 = vrot.lane.b32.xlu1 %v53_v41, %s158_s14 }
  0x27   :  { %100 = vrot.lane.b32.xlu2 %v54_v46, %s158_s14 }
  0x2c   :  { %102 = vrot.lane.b32.xlu0 %v55_v47, %s158_s14 }
  0x61   :  { %v81_v48 = vpop.permute.xlu2 %80 }
  0x62   :  { %v124_v49 = vmax.f32 %v44_v12, %v81_v48 }
  0x64   :  { %141 = vst.msk [vmem:[%s378_s1 + $0x20] sm:$0xff] %vm136_vm0, %v124_v49 }
  0x69   :  { %v83_v50 = vpop.permute.xlu2 %82 }
  0x6a   :  { %v125_v51 = vmax.f32 %v45_v19, %v83_v50 }
  0x6c   :  { %142 = vst.msk [vmem:[%s378_s1 + $0x28] sm:$0xff] %vm136_vm0, %v125_v51 }
  0x71   :  { %v89_v52 = vpop.permute.xlu2 %88 }
  0x72   :  { %v128_v53 = vmax.f32 %v48_v28, %v89_v52 }
  0x74   :  { %145 = vst.msk [vmem:[%s378_s1 + $0x40] sm:$0xff] %vm136_vm0, %v128_v53 }
  0x76   :  { %v73_v54 = vpop.permute.xlu0 %72 }
  0x77   :  { %v120_v55 = vmax.f32 %v178_v3, %v73_v54  ;;  %v77_v56 = vpop.permute.xlu1 %76 }
  0x78   :  { %v122_v57 = vmax.f32 %v183_v5, %v77_v56 }
  0x79   :  { %137 = vst.msk [vmem:[%s378_s1] sm:$0xff] %vm136_vm0, %v120_v55  ;;  %v95_v58 = vpop.permute.xlu2 %94 }
  0x7a   :  { %139 = vst.msk [vmem:[%s378_s1 + $0x10] sm:$0xff] %vm136_vm0, %v122_v57  ;;  %v131_v59 = vmax.f32 %v51_v37, %v95_v58 }
  0x7c   :  { %148 = vst.msk [vmem:[%s378_s1 + $0x58] sm:$0xff] %vm136_vm0, %v131_v59 }
  0x7e   :  { %v75_v60 = vpop.permute.xlu0 %74 }
  0x7f   :  { %v121_v61 = vmax.f32 %v207_v13, %v75_v60  ;;  %v79_v62 = vpop.permute.xlu1 %78 }
  0x80   :  { %v123_v63 = vmax.f32 %v209_v14, %v79_v62 }
  0x81   :  { %138 = vst.msk [vmem:[%s378_s1 + $0x8] sm:$0xff] %vm136_vm0, %v121_v61  ;;  %v101_v0 = vpop.permute.xlu2 %100 }
  0x82   :  { %140 = vst.msk [vmem:[%s378_s1 + $0x18] sm:$0xff] %vm136_vm0, %v123_v63  ;;  %v134_v1 = vmax.f32 %v54_v46, %v101_v0 }
  0x84   :  { %151 = vst.msk [vmem:[%s378_s1 + $0x70] sm:$0xff] %vm136_vm0, %v134_v1 }
  0x86   :  { %v85_v2 = vpop.permute.xlu0 %84 }
  0x87   :  { %v126_v3 = vmax.f32 %v234_v22, %v85_v2  ;;  %v87_v4 = vpop.permute.xlu1 %86 }
  0x88   :  { %v127_v5 = vmax.f32 %v236_v23, %v87_v4 }
  0x89   :  { %143 = vst.msk [vmem:[%s378_s1 + $0x30] sm:$0xff] %vm136_vm0, %v126_v3 }
  0x8a   :  { %144 = vst.msk [vmem:[%s378_s1 + $0x38] sm:$0xff] %vm136_vm0, %v127_v5 }
  0x8e   :  { %v91_v6 = vpop.permute.xlu0 %90 }
  0x8f   :  { %v129_v7 = vmax.f32 %v261_v31, %v91_v6  ;;  %v93_v8 = vpop.permute.xlu1 %92 }
  0x90   :  { %v130_v9 = vmax.f32 %v263_v32, %v93_v8 }
  0x91   :  { %146 = vst.msk [vmem:[%s378_s1 + $0x48] sm:$0xff] %vm136_vm0, %v129_v7 }
  0x92   :  { %147 = vst.msk [vmem:[%s378_s1 + $0x50] sm:$0xff] %vm136_vm0, %v130_v9 }
  0x96   :  { %v97_v10 = vpop.permute.xlu0 %96 }
  0x97   :  { %v132_v11 = vmax.f32 %v52_v40, %v97_v10  ;;  %v99_v12 = vpop.permute.xlu1 %98 }
  0x98   :  { %v133_v13 = vmax.f32 %v53_v41, %v99_v12 }
  0x99   :  { %149 = vst.msk [vmem:[%s378_s1 + $0x60] sm:$0xff] %vm136_vm0, %v132_v11 }
  0x9a   :  { %150 = vst.msk [vmem:[%s378_s1 + $0x68] sm:$0xff] %vm136_vm0, %v133_v13 }
  0x9e   :  { %v103_v14 = vpop.permute.xlu0 %102 }
  0x9f   :  { %v135_v15 = vmax.f32 %v55_v47, %v103_v14 }
  0xa1   :  { %152 = vst.msk [vmem:[%s378_s1 + $0x78] sm:$0xff] %vm136_vm0, %v135_v15 }

</bundles_post_ra>
